<compile_context>
chip_gen: v5e
topology: v5e:2x2
jax: 0.10.0
libtpu: 0.0.40
codegen_flags: <defaults>
</compile_context>

<pallas_src>
import functools

import numpy as np
import jax
import jax.numpy as jnp
from jax.experimental import pallas as pl
from jax.experimental.pallas import tpu as pltpu

ALPHA = 0.25
GAMMA = 2.0
EPS = 1e-8            # reference-only (log(p + 1e-8) in the PyTorch module)
LOGIT_CLAMP = 50.0    # keeps exp(-x) finite; sigmoid saturates far before |x|=50
AREA_EPS = 1e-12      # guards union*carea against 0/0 on degenerate boxes


def _round_up(x, m):
    return ((x + m - 1) // m) * m


def _pow_gamma(x):
    # keep GAMMA configurable without paying a transcendental pow at 2.0
    if GAMMA == 2.0:
        return jnp.square(x)
    return x ** GAMMA


# ----------------------------------------------------------------------------
# TPU properties (generation-aware tiling / VMEM budgeting)
# ----------------------------------------------------------------------------
@functools.lru_cache(maxsize=None)
def _tpu_props():
    """(physical VMEM bytes, TensorCores per device) with safe fallbacks."""
    vmem = 64 * 1024 * 1024   # conservative (v7x-sized) fallback
    cores = 1
    try:
        info = pltpu.get_tpu_info()
        vmem = int(getattr(info, "vmem_capacity_bytes", vmem) or vmem)
        for name in ("num_cores", "core_count", "num_tensorcores",
                     "tensorcore_count"):
            val = getattr(info, name, None)
            if val:
                cores = max(cores, int(val))
                break
    except Exception:
        pass
    if cores == 1:
        try:
            kind = jax.devices()[0].device_kind.lower()
            # megacore (v4 / v5p) and v7x expose two TensorCores per device
            if ("v4" in kind) or ("v5p" in kind) or ("v7" in kind):
                cores = 2
        except Exception:
            pass
    return vmem, cores


@functools.lru_cache(maxsize=None)
def _single_buffer_supported():
    """Probe pipeline_mode=pl.Buffered(1) once: grid-invariant inputs only need
    a single VMEM buffer (they are never re-DMA'd).  Unsupported JAX versions
    silently fall back to default double-buffering."""
    if not hasattr(pl, "Buffered"):
        return False
    try:
        def _probe(x_ref, o_ref):
            o_ref[...] = x_ref[...] + 1.0

        fn = pl.pallas_call(
            _probe,
            out_shape=jax.ShapeDtypeStruct((8, 128), jnp.float32),
            grid=(2,),
            in_specs=[pl.BlockSpec((8, 128), lambda i: (0, 0),
                                   pipeline_mode=pl.Buffered(1))],
            out_specs=pl.BlockSpec((8, 128), lambda i: (0, 0)),
        )
        out = jax.jit(fn)(jnp.zeros((8, 128), jnp.float32))
        out = np.asarray(jax.block_until_ready(out))
        return bool(np.allclose(out, 1.0))
    except Exception:
        return False


# ----------------------------------------------------------------------------
# Tiling heuristics
# ----------------------------------------------------------------------------
def _choose_query_tiling(nq, num_cores, max_tq):
    """Query tile: as large as possible (amortize the ~0.35us/step grid overhead
    and fill the MXU M extent), but on multi-TensorCore parts (v7x, megacore)
    aim for >=2 steps per core so each step's DMAs hide behind another step's
    compute.  Single-TC parts (v5e/v6e) never force a split."""
    if num_cores > 1 and nq >= num_cores * 2 * 128:
        min_steps = 2 * num_cores
    elif num_cores > 1 and nq >= num_cores * 16:
        min_steps = num_cores
    else:
        min_steps = 1
    steps = max(min_steps, pl.cdiv(nq, max_tq))
    if num_cores > 1 and steps > 1:
        steps = pl.cdiv(steps, num_cores) * num_cores   # equal share per core
    tq = max(8, _round_up(pl.cdiv(nq, steps), 8))
    nq_pad = _round_up(nq, tq)
    return tq, nq_pad


def _choose_target_tiling(nt, c_pad, tq, vmem_cap, max_tnt):
    """NT is the lane axis: keep it a wide multiple of 128 (lane-dense stores).
    Tile it only when the resident footprint (one-hot + target slab + streamed
    logits/output tiles) would blow the per-generation VMEM budget."""
    nt_pad = _round_up(max(nt, 1), 128)
    if max_tnt is not None:
        tnt = max(128, min(nt_pad, _round_up(int(max_tnt), 128)))
    else:
        budget = int(0.6 * vmem_cap)                      # leave room for temps
        fixed = 4 * (2 * tq * c_pad + 2 * tq * 4)         # streamed logits+boxes
        per_lane = 4 * (c_pad + 9 + 2 * tq)               # one-hot + slab + out cols
        fit = max(128, ((budget - fixed) // max(per_lane, 1)) // 128 * 128)
        tnt = min(nt_pad, max(fit, min(nt_pad, 1024)))    # never narrower than 1024
    return tnt, _round_up(nt_pad, tnt)


# ----------------------------------------------------------------------------
# Pallas kernel: one (TQ, TNT) tile of
#   C = w_bbox * cdist_L1(boxes, tgt_boxes)
#     + w_class * (pos_focal - neg_focal) gathered on tgt_ids
#     - w_giou  * GIoU(xyxy(boxes), xyxy(tgt_boxes))
# ----------------------------------------------------------------------------
def _cost_kernel(logits_ref, obox_ref, onehot_ref, tbox_ref, c_ref,
                 *, w_class, w_bbox, w_giou):
    # ---- classification cost -------------------------------------------------
    # Gather-first: the one-hot matmul is an exact column gather of the raw
    # logits, so the focal chain runs on (TQ, TNT) elements instead of (TQ, C).
    x = jnp.dot(logits_ref[...], onehot_ref[...],
                preferred_element_type=jnp.float32)               # (TQ, TNT)
    # Log-sigmoid form shares one log between both focal terms (3 EUP pushes
    # per element instead of 4): p = 1/(1+e^-x), -log p = lse, -log(1-p) = x+lse,
    # 1-p = e*p (VPU).  Clamp only keeps exp finite; sigmoid is saturated long
    # before |x|=50.  (The reference's log(p+1e-8) floors the log near -18.4;
    # this eps-free form only diverges for |logits| > ~18.)
    x = jnp.clip(x, -LOGIT_CLAMP, LOGIT_CLAMP)
    e = jnp.exp(-x)                                               # EUP
    denom = 1.0 + e
    # approx=False: the Newton refinement lands on the VALU (slack here) and
    # keeps 1e-5 parity with the pure-JAX reference.
    p = pl.reciprocal(denom)                                      # EUP
    lse = jnp.log(denom)                                          # EUP (= -log p)
    one_m_p = e * p                                               # VPU (= 1 - p)
    neg = (1.0 - ALPHA) * _pow_gamma(p) * (x + lse)               # -log(1-p) = x+lse
    pos = ALPHA * _pow_gamma(one_m_p) * lse                       # -log(p)   = lse
    cost_class = pos - neg                                        # (TQ, TNT)

    # ---- box costs -------------------------------------------------------------
    ob = obox_ref[...]                                            # (TQ, 4) cxcywh
    ocx, ocy, ow, oh = ob[:, 0:1], ob[:, 1:2], ob[:, 2:3], ob[:, 3:4]

    # Target side arrives as a precomputed (9, TNT) slab:
    #   cx, cy, w, h, x1, y1, x2, y2, area
    tb = tbox_ref[...]
    tcx, tcy, tw, th = tb[0:1, :], tb[1:2, :], tb[2:3, :], tb[3:4, :]
    tx1, ty1, tx2, ty2 = tb[4:5, :], tb[5:6, :], tb[6:7, :], tb[7:8, :]
    area_t = tb[8:9, :]

    # L1 box cost
    cost_bbox = (jnp.abs(ocx - tcx) + jnp.abs(ocy - tcy)
                 + jnp.abs(ow - tw) + jnp.abs(oh - th))

    # pred cxcywh -> xyxy
    ox1, oy1 = ocx - 0.5 * ow, ocy - 0.5 * oh
    ox2, oy2 = ocx + 0.5 * ow, ocy + 0.5 * oh
    area_o = ow * oh

    # generalized IoU
    iw = jnp.maximum(jnp.minimum(ox2, tx2) - jnp.maximum(ox1, tx1), 0.0)
    ih = jnp.maximum(jnp.minimum(oy2, ty2) - jnp.maximum(oy1, ty1), 0.0)
    inter = iw * ih
    union = area_o + area_t - inter

    cw = jnp.maximum(jnp.maximum(ox2, tx2) - jnp.minimum(ox1, tx1), 0.0)
    ch = jnp.maximum(jnp.maximum(oy2, ty2) - jnp.minimum(oy1, ty1), 0.0)
    carea = cw * ch

    # giou = inter/union - (carea-union)/carea, fused into ONE reciprocal of
    # (union*carea); the eps clamp guarantees no 0/0 on degenerate/padded boxes.
    inv = pl.reciprocal(jnp.maximum(union * carea, AREA_EPS))     # EUP
    giou = (inter * carea - (carea - union) * union) * inv

    c_ref[...] = w_bbox * cost_bbox + w_class * cost_class - w_giou * giou


# ----------------------------------------------------------------------------
# Jitted wrapper: padding, one-hot, target slab, pallas_call, final slice
# ----------------------------------------------------------------------------
def _cost_matrix_impl(logits, boxes, tgt_ids, tgt_bbox, *,
                      w_class, w_bbox, w_giou, max_tq, max_tnt):
    nq, c = logits.shape
    nt = tgt_ids.shape[0]
    f32 = jnp.float32

    vmem_cap, num_cores = _tpu_props()
    c_pad = _round_up(max(c, 1), 128)
    tq, nq_pad = _choose_query_tiling(nq, num_cores, max_tq)
    tnt, nt_pad = _choose_target_tiling(nt, c_pad, tq, vmem_cap, max_tnt)
    nq_tiles, nt_tiles = nq_pad // tq, nt_pad // tnt

    logits_p = jnp.pad(logits.astype(f32), ((0, nq_pad - nq), (0, c_pad - c)))

    # padded query rows / target columns get dummy unit boxes so GIoU stays
    # well-conditioned on padding cells (belt-and-suspenders on top of AREA_EPS)
    dummy = jnp.array([0.5, 0.5, 1.0, 1.0], f32)
    boxes_p = boxes.astype(f32)
    if nq_pad > nq:
        boxes_p = jnp.concatenate(
            [boxes_p, jnp.broadcast_to(dummy, (nq_pad - nq, 4))], axis=0)
    tbox_p = tgt_bbox.astype(f32)
    if nt_pad > nt:
        tbox_p = jnp.concatenate(
            [tbox_p, jnp.broadcast_to(dummy, (nt_pad - nt, 4))], axis=0)

    # target-side slab: cxcywh + xyxy corners + area, targets on the lane axis
    tcx, tcy, tw, th = tbox_p[:, 0], tbox_p[:, 1], tbox_p[:, 2], tbox_p[:, 3]
    tslab = jnp.stack([tcx, tcy, tw, th,
                       tcx - 0.5 * tw, tcy - 0.5 * th,
                       tcx + 0.5 * tw, tcy + 0.5 * th,
                       tw * th], axis=0)                           # (9, NT_pad)

    # one-hot gather matrix, class axis on sublanes, targets on lanes
    # (for very large num_classes this could be stored in bf16 -- exact for
    #  0/1 values -- to halve its footprint; kept f32 here since the gather
    #  matmul runs with f32 logits anyway)
    onehot = jax.nn.one_hot(tgt_ids, c, dtype=f32).T               # (C, NT)
    onehot_p = jnp.pad(onehot, ((0, c_pad - c), (0, nt_pad - nt)))

    kernel = functools.partial(_cost_kernel, w_class=float(w_class),
                               w_bbox=float(w_bbox), w_giou=float(w_giou))

    # grid-invariant inputs only need one buffer when there is a single NT tile
    single_buf = (nt_tiles == 1) and _single_buffer_supported()

    def _spec(shape, index_map, single):
        if single:
            return pl.BlockSpec(shape, index_map, pipeline_mode=pl.Buffered(1))
        return pl.BlockSpec(shape, index_map)

    in_specs = [
        pl.BlockSpec((tq, c_pad), lambda j, i: (i, 0)),            # logits (streamed)
        pl.BlockSpec((tq, 4), lambda j, i: (i, 0)),                # pred boxes
        _spec((c_pad, tnt), lambda j, i: (0, j), single_buf),      # one-hot gather
        _spec((9, tnt), lambda j, i: (0, j), single_buf),          # target slab
    ]
    out_spec = pl.BlockSpec((tq, tnt), lambda j, i: (i, j))

    # VMEM budget: streamed tiles double-buffered, grid-invariant tiles counted
    # once when single-buffered; +25% headroom for Mosaic temporaries; capped
    # at 85% of the queried per-generation capacity (v5e/v6e: ~109 MiB allowed,
    # v7x: ~54 MiB), floored above the scoped default.
    tgt_bufs = 1 if single_buf else 2
    est = 4 * (2 * tq * c_pad + 2 * tq * 4
               + tgt_bufs * (c_pad * tnt + 9 * tnt)
               + 2 * tq * tnt)
    vmem_limit = int(min(max(est * 1.25, 32 * 1024 * 1024), 0.85 * vmem_cap))

    c_full = pl.pallas_call(
        kernel,
        out_shape=jax.ShapeDtypeStruct((nq_pad, nt_pad), jnp.float32),
        grid_spec=pltpu.PrefetchScalarGridSpec(
            num_scalar_prefetch=0,
            grid=(nt_tiles, nq_tiles),     # queries innermost: one-hot tile reused
            in_specs=in_specs,
            out_specs=out_spec,
        ),
        compiler_params=pltpu.CompilerParams(
            dimension_semantics=("parallel", "parallel"),
            vmem_limit_bytes=vmem_limit),
    )(logits_p, boxes_p, onehot_p, tslab)
    return c_full[:nq, :nt]


_cost_matrix_jit = jax.jit(
    _cost_matrix_impl,
    static_argnames=("w_class", "w_bbox", "w_giou", "max_tq", "max_tnt"))


def compute_cost_matrix(logits, boxes, tgt_ids, tgt_bbox,
                        w_class=1.0, w_bbox=1.0, w_giou=1.0,
                        max_tq=512, max_tnt=None):
    """logits (NQ, C), boxes (NQ, 4) cxcywh, tgt_ids (NT,), tgt_bbox (NT, 4)
    -> cost matrix (NQ, NT).  The whole padding/one-hot/pallas_call/slice chain
    is jitted (shape-specialized) so the layout plumbing fuses into one program."""
    return _cost_matrix_jit(
        jnp.asarray(logits, jnp.float32), jnp.asarray(boxes, jnp.float32),
        jnp.asarray(tgt_ids, jnp.int32), jnp.asarray(tgt_bbox, jnp.float32),
        w_class=float(w_class), w_bbox=float(w_bbox), w_giou=float(w_giou),
        max_tq=int(max_tq), max_tnt=max_tnt)


# ----------------------------------------------------------------------------
# Host-side Hungarian. Prefer scipy; fall back to a pure-numpy
# Jonker-Volgenant (e-maxx potentials) implementation with identical semantics.
# ----------------------------------------------------------------------------
def _numpy_lsa(cost):
    cost = np.asarray(cost, dtype=np.float64)
    transposed = cost.shape[0] > cost.shape[1]
    if transposed:
        cost = cost.T
    n, m = cost.shape  # n <= m
    INF = float("inf")
    u = np.zeros(n + 1)
    v = np.zeros(m + 1)
    p = np.zeros(m + 1, dtype=np.int64)
    way = np.zeros(m + 1, dtype=np.int64)
    for i in range(1, n + 1):
        p[0] = i
        j0 = 0
        minv = np.full(m + 1, INF)
        used = np.zeros(m + 1, dtype=bool)
        while True:
            used[j0] = True
            i0 = p[j0]
            free = ~used[1:]
            cur = cost[i0 - 1, :] - u[i0] - v[1:]
            upd = free & (cur < minv[1:])
            minv[1:][upd] = cur[upd]
            way[1:][upd] = j0
            masked = np.where(free, minv[1:], INF)
            j1 = int(np.argmin(masked)) + 1
            delta = masked[j1 - 1]
            u[p[used]] += delta
            v[used] -= delta
            minv[~used] -= delta
            j0 = j1
            if p[j0] == 0:
                break
        while True:
            j1 = way[j0]
            p[j0] = p[j1]
            j0 = j1
            if j0 == 0:
                break
    rows, cols = [], []
    for j in range(1, m + 1):
        if p[j] != 0:
            rows.append(p[j] - 1)
            cols.append(j - 1)
    rows = np.asarray(rows, dtype=np.int64)
    cols = np.asarray(cols, dtype=np.int64)
    if transposed:
        rows, cols = cols, rows
    order = np.argsort(rows)
    return rows[order], cols[order]


try:
    from scipy.optimize import linear_sum_assignment as _lsa
except Exception:  # pragma: no cover - scipy not installed
    _lsa = _numpy_lsa


# ----------------------------------------------------------------------------
# HungarianMatcher forward
# ----------------------------------------------------------------------------
def hungarian_matcher(pred_logits, pred_boxes, targets,
                      cost_class=1.0, cost_bbox=1.0, cost_giou=1.0):
    """targets: list of dicts with 'labels' (T_b,) int and 'boxes' (T_b, 4)."""
    bs, num_queries, num_classes = pred_logits.shape
    nq = bs * num_queries

    tgt_ids = jnp.concatenate([jnp.asarray(t["labels"], jnp.int32) for t in targets])
    tgt_bbox = jnp.concatenate([jnp.asarray(t["boxes"], jnp.float32) for t in targets],
                               axis=0)

    C = compute_cost_matrix(pred_logits.reshape(nq, num_classes),
                            pred_boxes.reshape(nq, 4),
                            tgt_ids, tgt_bbox,
                            cost_class, cost_bbox, cost_giou)
    C = np.asarray(jax.block_until_ready(C)).reshape(bs, num_queries, -1)

    # TODO(synk): linear_sum_assignment is an inherently sequential algorithm
    # with no clean Pallas/TPU equivalent; it runs on the host.
    sizes = [int(np.asarray(t["boxes"]).shape[0]) for t in targets]
    indices = []
    offset = 0
    for b, sz in enumerate(sizes):
        sub = C[b, :, offset:offset + sz]
        offset += sz
        if sz == 0:
            indices.append((np.zeros(0, np.int64), np.zeros(0, np.int64)))
            continue
        rows, cols = _lsa(sub)
        rows = np.asarray(rows, dtype=np.int64)
        cols = np.asarray(cols, dtype=np.int64)
        order = np.argsort(rows)
        indices.append((rows[order], cols[order]))
    return indices, C


# ----------------------------------------------------------------------------
# Pure-JAX reference for the cost matrix (correctness check).
# ----------------------------------------------------------------------------
def _reference_cost(logits, boxes, tgt_ids, tgt_bbox, wc, wb, wg):
    p = jax.nn.sigmoid(logits)
    neg = (1.0 - ALPHA) * jnp.square(p) * (-jnp.log(1.0 - p + EPS))
    pos = ALPHA * jnp.square(1.0 - p) * (-jnp.log(p + EPS))
    cost_class = (pos - neg)[:, tgt_ids]
    cost_bbox = jnp.sum(jnp.abs(boxes[:, None, :] - tgt_bbox[None, :, :]), axis=-1)

    def to_xyxy(b):
        cx, cy, w, h = b[..., 0], b[..., 1], b[..., 2], b[..., 3]
        return jnp.stack([cx - 0.5 * w, cy - 0.5 * h, cx + 0.5 * w, cy + 0.5 * h], -1)

    b1, b2 = to_xyxy(boxes), to_xyxy(tgt_bbox)
    area1 = (b1[:, 2] - b1[:, 0]) * (b1[:, 3] - b1[:, 1])
    area2 = (b2[:, 2] - b2[:, 0]) * (b2[:, 3] - b2[:, 1])
    lt = jnp.maximum(b1[:, None, :2], b2[None, :, :2])
    rb = jnp.minimum(b1[:, None, 2:], b2[None, :, 2:])
    wh = jnp.clip(rb - lt, 0.0)
    inter = wh[..., 0] * wh[..., 1]
    union = area1[:, None] + area2[None, :] - inter
    iou = inter / union
    lt2 = jnp.minimum(b1[:, None, :2], b2[None, :, :2])
    rb2 = jnp.maximum(b1[:, None, 2:], b2[None, :, 2:])
    wh2 = jnp.clip(rb2 - lt2, 0.0)
    carea = wh2[..., 0] * wh2[..., 1]
    giou = iou - (carea - union) / carea
    return wb * cost_bbox + wc * cost_class + wg * (-giou)


if __name__ == "__main__":
    key = jax.random.PRNGKey(0)
    bs, num_queries, num_classes = 2, 8, 8
    sizes = [3, 5]

    k1, k2, k3, k4 = jax.random.split(key, 4)
    pred_logits = jax.random.normal(k1, (bs, num_queries, num_classes), jnp.float32)
    # boxes are cxcywh in (0,1): centers in [0.25,0.75], sizes in [0.1,0.3]
    cxy = 0.25 + 0.5 * jax.random.uniform(k2, (bs, num_queries, 2))
    wh = 0.1 + 0.2 * jax.random.uniform(k3, (bs, num_queries, 2))
    pred_boxes = jnp.concatenate([cxy, wh], axis=-1)

    targets = []
    tkeys = jax.random.split(k4, len(sizes) * 3)
    for b, sz in enumerate(sizes):
        kl, kc, ks = tkeys[3 * b], tkeys[3 * b + 1], tkeys[3 * b + 2]
        labels = jax.random.randint(kl, (sz,), 0, num_classes, jnp.int32)
        tcxy = 0.25 + 0.5 * jax.random.uniform(kc, (sz, 2))
        twh = 0.1 + 0.2 * jax.random.uniform(ks, (sz, 2))
        targets.append({"labels": labels,
                        "boxes": jnp.concatenate([tcxy, twh], axis=-1)})

    indices, C_kernel = hungarian_matcher(pred_logits, pred_boxes, targets,
                                          cost_class=1.0, cost_bbox=1.0,
                                          cost_giou=1.0)

    # correctness check of the Pallas-computed cost matrix vs pure-JAX reference
    tgt_ids = jnp.concatenate([t["labels"] for t in targets])
    tgt_bbox = jnp.concatenate([t["boxes"] for t in targets], axis=0)
    C_ref = _reference_cost(pred_logits.reshape(-1, num_classes),
                            pred_boxes.reshape(-1, 4),
                            tgt_ids, tgt_bbox, 1.0, 1.0, 1.0)
    C_ref = np.asarray(C_ref).reshape(bs, num_queries, -1)
    np.testing.assert_allclose(C_kernel, C_ref, rtol=1e-5, atol=1e-5)

    # sanity on assignment shapes
    for (rows, cols), sz in zip(indices, sizes):
        assert len(rows) == len(cols) == min(num_queries, sz)

    # second check: force the 2-D grid (query x NT tiling) path
    nq2, c2, nt2 = 64, 16, 200
    ka, kb, kc2, kd, ke = jax.random.split(jax.random.PRNGKey(1), 5)
    logits2 = jax.random.normal(ka, (nq2, c2), jnp.float32)
    bcxy = 0.25 + 0.5 * jax.random.uniform(kb, (nq2, 2))
    bwh = 0.1 + 0.2 * jax.random.uniform(kc2, (nq2, 2))
    boxes2 = jnp.concatenate([bcxy, bwh], axis=-1)
    ids2 = jax.random.randint(kd, (nt2,), 0, c2, jnp.int32)
    kt1, kt2 = jax.random.split(ke)
    tcxy2 = 0.25 + 0.5 * jax.random.uniform(kt1, (nt2, 2))
    twh2 = 0.1 + 0.2 * jax.random.uniform(kt2, (nt2, 2))
    tbox2 = jnp.concatenate([tcxy2, twh2], axis=-1)
    C2 = jax.block_until_ready(
        compute_cost_matrix(logits2, boxes2, ids2, tbox2, max_tq=32, max_tnt=128))
    C2_ref = _reference_cost(logits2, boxes2, ids2, tbox2, 1.0, 1.0, 1.0)
    np.testing.assert_allclose(np.asarray(C2), np.asarray(C2_ref),
                               rtol=1e-5, atol=1e-5)

    print("KERNEL_OK")
</pallas_src>

<mosaic_0001>
module attributes {stable_mosaic.version = 11 : i64} {
  func.func @_probe(%arg0: i32, %arg1: memref<8x128xf32, #tpu.memory_space<vmem>>, %arg2: memref<8x128xf32, #tpu.memory_space<vmem>>) attributes {dimension_semantics = [#tpu.dimension_semantics<arbitrary>], iteration_bounds = array<i64: 2>, scalar_prefetch = 0 : i64, scratch_operands = 0 : i64, tpu.core_type = #tpu.core_type<tc>, window_params = [{pipeline_mode = #tpu.pipeline_mode<synchronous>, transform_indices = @transform_0, window_bounds = array<i64: 8, 128>}, {pipeline_mode = #tpu.pipeline_mode<synchronous>, transform_indices = @transform_1, window_bounds = array<i64: 8, 128>}]} {
    %c0 = arith.constant 0 : index
    %c0_0 = arith.constant 0 : index
    %0 = vector.load %arg1[%c0, %c0_0] : memref<8x128xf32, #tpu.memory_space<vmem>>, vector<8x128xf32>
    %cst = arith.constant 1.000000e+00 : f32
    %1 = vector.broadcast %cst : f32 to vector<8x128xf32>
    %2 = arith.addf %0, %1 : vector<8x128xf32>
    %c0_1 = arith.constant 0 : index
    %c0_2 = arith.constant 0 : index
    %3 = vector.load %arg2[%c0_1, %c0_2] : memref<8x128xf32, #tpu.memory_space<vmem>>, vector<8x128xf32>
    tpu.vector_store %arg2[%c0_1, %c0_2], %2 {strides = array<i32>} : memref<8x128xf32, #tpu.memory_space<vmem>>, vector<8x128xf32>,
    return
  }
  func.func @transform_0(%arg0: i32) -> (i32, i32) {
    %c0_i32 = arith.constant 0 : i32
    %c0_i32_0 = arith.constant 0 : i32
    %c0_i32_1 = arith.constant 0 : i32
    return %c0_i32, %c0_i32_0 : i32, i32
  }
  func.func @transform_1(%arg0: i32) -> (i32, i32) {
    %c0_i32 = arith.constant 0 : i32
    %c0_i32_0 = arith.constant 0 : i32
    %c0_i32_1 = arith.constant 0 : i32
    return %c0_i32, %c0_i32_0 : i32, i32
  }
}

module attributes {stable_mosaic.version = 11 : i64} {
  func.func @_cost_kernel(%arg0: i32, %arg1: i32, %arg2: memref<16x128xf32, #tpu.memory_space<vmem>>, %arg3: memref<16x4xf32, #tpu.memory_space<vmem>>, %arg4: memref<128x128xf32, #tpu.memory_space<vmem>>, %arg5: memref<9x128xf32, #tpu.memory_space<vmem>>, %arg6: memref<16x128xf32, #tpu.memory_space<vmem>>) attributes {dimension_semantics = [#tpu.dimension_semantics<parallel>, #tpu.dimension_semantics<parallel>], iteration_bounds = array<i64: 1, 1>, scalar_prefetch = 0 : i64, scratch_operands = 0 : i64, tpu.core_type = #tpu.core_type<tc>, window_params = [{transform_indices = @transform_0, window_bounds = array<i64: 16, 128>}, {transform_indices = @transform_1, window_bounds = array<i64: 16, 4>}, {transform_indices = @transform_2, window_bounds = array<i64: 128, 128>}, {transform_indices = @transform_3, window_bounds = array<i64: 9, 128>}, {transform_indices = @transform_4, window_bounds = array<i64: 16, 128>}]} {
    %c0 = arith.constant 0 : index
    %c0_0 = arith.constant 0 : index
    %0 = vector.load %arg2[%c0, %c0_0] : memref<16x128xf32, #tpu.memory_space<vmem>>, vector<16x128xf32>
    %c0_1 = arith.constant 0 : index
    %c0_2 = arith.constant 0 : index
    %1 = vector.load %arg4[%c0_1, %c0_2] : memref<128x128xf32, #tpu.memory_space<vmem>>, vector<128x128xf32>
    %cst = arith.constant dense<0.000000e+00> : vector<16x128xf32>
    %2 = tpu.matmul %0, %1, %cst {dimension_numbers = #tpu.dot_dimension_numbers<[1], [0], [0], [1], [0, 0, 1, 1], [], []>} : vector<16x128xf32>, vector<128x128xf32>, vector<16x128xf32> -> vector<16x128xf32>
    %cst_3 = arith.constant -5.000000e+01 : f32
    %cst_4 = arith.constant 5.000000e+01 : f32
    %3 = vector.broadcast %cst_3 : f32 to vector<16x128xf32>
    %4 = arith.maximumf %3, %2 : vector<16x128xf32>
    %5 = vector.broadcast %cst_4 : f32 to vector<16x128xf32>
    %6 = arith.minimumf %5, %4 : vector<16x128xf32>
    %cst_5 = arith.constant 0.000000e+00 : f32
    %7 = vector.broadcast %cst_5 : f32 to vector<16x128xf32>
    %8 = arith.subf %7, %6 : vector<16x128xf32>
    %9 = math.exp %8 : vector<16x128xf32>
    %cst_6 = arith.constant 1.000000e+00 : f32
    %10 = vector.broadcast %cst_6 : f32 to vector<16x128xf32>
    %11 = arith.addf %10, %9 : vector<16x128xf32>
    %12 = tpu.reciprocal %11 : vector<16x128xf32> -> vector<16x128xf32>
    %13 = math.log %11 : vector<16x128xf32>
    %14 = arith.mulf %9, %12 : vector<16x128xf32>
    %15 = arith.mulf %12, %12 : vector<16x128xf32>
    %cst_7 = arith.constant 7.500000e-01 : f32
    %16 = vector.broadcast %cst_7 : f32 to vector<16x128xf32>
    %17 = arith.mulf %16, %15 : vector<16x128xf32>
    %18 = arith.addf %6, %13 : vector<16x128xf32>
    %19 = arith.mulf %17, %18 : vector<16x128xf32>
    %20 = arith.mulf %14, %14 : vector<16x128xf32>
    %cst_8 = arith.constant 2.500000e-01 : f32
    %21 = vector.broadcast %cst_8 : f32 to vector<16x128xf32>
    %22 = arith.mulf %21, %20 : vector<16x128xf32>
    %23 = arith.mulf %22, %13 : vector<16x128xf32>
    %24 = arith.subf %23, %19 : vector<16x128xf32>
    %c0_9 = arith.constant 0 : index
    %c0_10 = arith.constant 0 : index
    %25 = vector.load %arg3[%c0_9, %c0_10] : memref<16x4xf32, #tpu.memory_space<vmem>>, vector<16x4xf32>
    %26 = vector.extract_strided_slice %25 {offsets = [0, 0], sizes = [16, 1], strides = [1, 1]} : vector<16x4xf32> to vector<16x1xf32>
    %27 = vector.extract_strided_slice %25 {offsets = [0, 1], sizes = [16, 1], strides = [1, 1]} : vector<16x4xf32> to vector<16x1xf32>
    %28 = vector.extract_strided_slice %25 {offsets = [0, 2], sizes = [16, 1], strides = [1, 1]} : vector<16x4xf32> to vector<16x1xf32>
    %29 = vector.extract_strided_slice %25 {offsets = [0, 3], sizes = [16, 1], strides = [1, 1]} : vector<16x4xf32> to vector<16x1xf32>
    %c0_11 = arith.constant 0 : index
    %c0_12 = arith.constant 0 : index
    %30 = vector.load %arg5[%c0_11, %c0_12] : memref<9x128xf32, #tpu.memory_space<vmem>>, vector<9x128xf32>
    %31 = vector.extract_strided_slice %30 {offsets = [0, 0], sizes = [1, 128], strides = [1, 1]} : vector<9x128xf32> to vector<1x128xf32>
    %32 = vector.extract_strided_slice %30 {offsets = [1, 0], sizes = [1, 128], strides = [1, 1]} : vector<9x128xf32> to vector<1x128xf32>
    %33 = vector.extract_strided_slice %30 {offsets = [2, 0], sizes = [1, 128], strides = [1, 1]} : vector<9x128xf32> to vector<1x128xf32>
    %34 = vector.extract_strided_slice %30 {offsets = [3, 0], sizes = [1, 128], strides = [1, 1]} : vector<9x128xf32> to vector<1x128xf32>
    %35 = vector.extract_strided_slice %30 {offsets = [4, 0], sizes = [1, 128], strides = [1, 1]} : vector<9x128xf32> to vector<1x128xf32>
    %36 = vector.extract_strided_slice %30 {offsets = [5, 0], sizes = [1, 128], strides = [1, 1]} : vector<9x128xf32> to vector<1x128xf32>
    %37 = vector.extract_strided_slice %30 {offsets = [6, 0], sizes = [1, 128], strides = [1, 1]} : vector<9x128xf32> to vector<1x128xf32>
    %38 = vector.extract_strided_slice %30 {offsets = [7, 0], sizes = [1, 128], strides = [1, 1]} : vector<9x128xf32> to vector<1x128xf32>
    %39 = vector.extract_strided_slice %30 {offsets = [8, 0], sizes = [1, 128], strides = [1, 1]} : vector<9x128xf32> to vector<1x128xf32>
    %40 = vector.broadcast %26 : vector<16x1xf32> to vector<16x128xf32>
    %41 = vector.broadcast %31 : vector<1x128xf32> to vector<16x128xf32>
    %42 = arith.subf %40, %41 : vector<16x128xf32>
    %43 = math.absf %42 : vector<16x128xf32>
    %44 = vector.broadcast %27 : vector<16x1xf32> to vector<16x128xf32>
    %45 = vector.broadcast %32 : vector<1x128xf32> to vector<16x128xf32>
    %46 = arith.subf %44, %45 : vector<16x128xf32>
    %47 = math.absf %46 : vector<16x128xf32>
    %48 = arith.addf %43, %47 : vector<16x128xf32>
    %49 = vector.broadcast %28 : vector<16x1xf32> to vector<16x128xf32>
    %50 = vector.broadcast %33 : vector<1x128xf32> to vector<16x128xf32>
    %51 = arith.subf %49, %50 : vector<16x128xf32>
    %52 = math.absf %51 : vector<16x128xf32>
    %53 = arith.addf %48, %52 : vector<16x128xf32>
    %54 = vector.broadcast %29 : vector<16x1xf32> to vector<16x128xf32>
    %55 = vector.broadcast %34 : vector<1x128xf32> to vector<16x128xf32>
    %56 = arith.subf %54, %55 : vector<16x128xf32>
    %57 = math.absf %56 : vector<16x128xf32>
    %58 = arith.addf %53, %57 : vector<16x128xf32>
    %cst_13 = arith.constant 5.000000e-01 : f32
    %59 = vector.broadcast %cst_13 : f32 to vector<16x1xf32>
    %60 = arith.mulf %59, %28 : vector<16x1xf32>
    %61 = arith.subf %26, %60 : vector<16x1xf32>
    %cst_14 = arith.constant 5.000000e-01 : f32
    %62 = vector.broadcast %cst_14 : f32 to vector<16x1xf32>
    %63 = arith.mulf %62, %29 : vector<16x1xf32>
    %64 = arith.subf %27, %63 : vector<16x1xf32>
    %cst_15 = arith.constant 5.000000e-01 : f32
    %65 = vector.broadcast %cst_15 : f32 to vector<16x1xf32>
    %66 = arith.mulf %65, %28 : vector<16x1xf32>
    %67 = arith.addf %26, %66 : vector<16x1xf32>
    %cst_16 = arith.constant 5.000000e-01 : f32
    %68 = vector.broadcast %cst_16 : f32 to vector<16x1xf32>
    %69 = arith.mulf %68, %29 : vector<16x1xf32>
    %70 = arith.addf %27, %69 : vector<16x1xf32>
    %71 = arith.mulf %28, %29 : vector<16x1xf32>
    %72 = vector.broadcast %67 : vector<16x1xf32> to vector<16x128xf32>
    %73 = vector.broadcast %37 : vector<1x128xf32> to vector<16x128xf32>
    %74 = arith.minimumf %72, %73 : vector<16x128xf32>
    %75 = vector.broadcast %61 : vector<16x1xf32> to vector<16x128xf32>
    %76 = vector.broadcast %35 : vector<1x128xf32> to vector<16x128xf32>
    %77 = arith.maximumf %75, %76 : vector<16x128xf32>
    %78 = arith.subf %74, %77 : vector<16x128xf32>
    %cst_17 = arith.constant 0.000000e+00 : f32
    %79 = vector.broadcast %cst_17 : f32 to vector<16x128xf32>
    %80 = arith.maximumf %78, %79 : vector<16x128xf32>
    %81 = vector.broadcast %70 : vector<16x1xf32> to vector<16x128xf32>
    %82 = vector.broadcast %38 : vector<1x128xf32> to vector<16x128xf32>
    %83 = arith.minimumf %81, %82 : vector<16x128xf32>
    %84 = vector.broadcast %64 : vector<16x1xf32> to vector<16x128xf32>
    %85 = vector.broadcast %36 : vector<1x128xf32> to vector<16x128xf32>
    %86 = arith.maximumf %84, %85 : vector<16x128xf32>
    %87 = arith.subf %83, %86 : vector<16x128xf32>
    %cst_18 = arith.constant 0.000000e+00 : f32
    %88 = vector.broadcast %cst_18 : f32 to vector<16x128xf32>
    %89 = arith.maximumf %87, %88 : vector<16x128xf32>
    %90 = arith.mulf %80, %89 : vector<16x128xf32>
    %91 = vector.broadcast %71 : vector<16x1xf32> to vector<16x128xf32>
    %92 = vector.broadcast %39 : vector<1x128xf32> to vector<16x128xf32>
    %93 = arith.addf %91, %92 : vector<16x128xf32>
    %94 = arith.subf %93, %90 : vector<16x128xf32>
    %95 = vector.broadcast %67 : vector<16x1xf32> to vector<16x128xf32>
    %96 = vector.broadcast %37 : vector<1x128xf32> to vector<16x128xf32>
    %97 = arith.maximumf %95, %96 : vector<16x128xf32>
    %98 = vector.broadcast %61 : vector<16x1xf32> to vector<16x128xf32>
    %99 = vector.broadcast %35 : vector<1x128xf32> to vector<16x128xf32>
    %100 = arith.minimumf %98, %99 : vector<16x128xf32>
    %101 = arith.subf %97, %100 : vector<16x128xf32>
    %cst_19 = arith.constant 0.000000e+00 : f32
    %102 = vector.broadcast %cst_19 : f32 to vector<16x128xf32>
    %103 = arith.maximumf %101, %102 : vector<16x128xf32>
    %104 = vector.broadcast %70 : vector<16x1xf32> to vector<16x128xf32>
    %105 = vector.broadcast %38 : vector<1x128xf32> to vector<16x128xf32>
    %106 = arith.maximumf %104, %105 : vector<16x128xf32>
    %107 = vector.broadcast %64 : vector<16x1xf32> to vector<16x128xf32>
    %108 = vector.broadcast %36 : vector<1x128xf32> to vector<16x128xf32>
    %109 = arith.minimumf %107, %108 : vector<16x128xf32>
    %110 = arith.subf %106, %109 : vector<16x128xf32>
    %cst_20 = arith.constant 0.000000e+00 : f32
    %111 = vector.broadcast %cst_20 : f32 to vector<16x128xf32>
    %112 = arith.maximumf %110, %111 : vector<16x128xf32>
    %113 = arith.mulf %103, %112 : vector<16x128xf32>
    %114 = arith.mulf %94, %113 : vector<16x128xf32>
    %cst_21 = arith.constant 9.99999996E-13 : f32
    %115 = vector.broadcast %cst_21 : f32 to vector<16x128xf32>
    %116 = arith.maximumf %114, %115 : vector<16x128xf32>
    %117 = tpu.reciprocal %116 : vector<16x128xf32> -> vector<16x128xf32>
    %118 = arith.mulf %90, %113 : vector<16x128xf32>
    %119 = arith.subf %113, %94 : vector<16x128xf32>
    %120 = arith.mulf %119, %94 : vector<16x128xf32>
    %121 = arith.subf %118, %120 : vector<16x128xf32>
    %122 = arith.mulf %121, %117 : vector<16x128xf32>
    %cst_22 = arith.constant 1.000000e+00 : f32
    %123 = vector.broadcast %cst_22 : f32 to vector<16x128xf32>
    %124 = arith.mulf %123, %58 : vector<16x128xf32>
    %cst_23 = arith.constant 1.000000e+00 : f32
    %125 = vector.broadcast %cst_23 : f32 to vector<16x128xf32>
    %126 = arith.mulf %125, %24 : vector<16x128xf32>
    %127 = arith.addf %124, %126 : vector<16x128xf32>
    %cst_24 = arith.constant 1.000000e+00 : f32
    %128 = vector.broadcast %cst_24 : f32 to vector<16x128xf32>
    %129 = arith.mulf %128, %122 : vector<16x128xf32>
    %130 = arith.subf %127, %129 : vector<16x128xf32>
    %c0_25 = arith.constant 0 : index
    %c0_26 = arith.constant 0 : index
    %131 = vector.load %arg6[%c0_25, %c0_26] : memref<16x128xf32, #tpu.memory_space<vmem>>, vector<16x128xf32>
    tpu.vector_store %arg6[%c0_25, %c0_26], %130 {strides = array<i32>} : memref<16x128xf32, #tpu.memory_space<vmem>>, vector<16x128xf32>,
    return
  }
  func.func @transform_0(%arg0: i32, %arg1: i32) -> (i32, i32) {
    %c0_i32 = arith.constant 0 : i32
    %c0_i32_0 = arith.constant 0 : i32
    return %arg1, %c0_i32 : i32, i32
  }
  func.func @transform_1(%arg0: i32, %arg1: i32) -> (i32, i32) {
    %c0_i32 = arith.constant 0 : i32
    %c0_i32_0 = arith.constant 0 : i32
    return %arg1, %c0_i32 : i32, i32
  }
  func.func @transform_2(%arg0: i32, %arg1: i32) -> (i32, i32) {
    %c0_i32 = arith.constant 0 : i32
    %c0_i32_0 = arith.constant 0 : i32
    return %c0_i32, %arg0 : i32, i32
  }
  func.func @transform_3(%arg0: i32, %arg1: i32) -> (i32, i32) {
    %c0_i32 = arith.constant 0 : i32
    %c0_i32_0 = arith.constant 0 : i32
    return %c0_i32, %arg0 : i32, i32
  }
  func.func @transform_4(%arg0: i32, %arg1: i32) -> (i32, i32) {
    %c0_i32 = arith.constant 0 : i32
    return %arg1, %arg0 : i32, i32
  }
}

</mosaic_0001>

<bundles_post_ra>
// kernel: tpu_custom_call.1
= control target key start
LH: loop header
LB: loop body
LE: loop exit
PB: predicated region body
PF: predicated region fallthrough
CT: control target
= control target key end

     0   :  { %6 = vsyncpa [#allocation3], 0  ;;  %s287_s0 = inlined_call_operand.hbm [shape: f32[8,128], index: 0, kind: input, shape index: {}]   ;;  %s288_s1 = inlined_call_operand.hbm [shape: f32[8,128], index: 1, kind: output, shape index: {}]  }
   0x1   :  { %7 = vsyncpa [#allocation4], 0  ;;  %s270_s6 = smov 0  }
   0x2 LB: > { %s149_s7 = sadd.s32 4294967295, %s256_s6   ;;  %p150_p0 = scmp.ge.s32.totalorder %s256_s6, 1  ;;  %s256_s6 = sphi %s270_s6, %s13_s6  }
   0x3   : > { %p60_p1 = scmp.lt.s32.totalorder %s256_s6, 3  ;;  %s72_s10 = sshll.u32 %s287_s0, 4  ;;  %s73_s10 = int_to_ptr.hbm [resolvable:$true] %s72_s10 }
   0x4   : > { %p170_p3 = scmp.eq.s32.totalorder %s149_s7, 0  ;;  %s258_s11 = smov [#allocation2]  }
   0x5   : > { %p61_p2 = pnand %p150_p0, %p60_p1  ;;  %s74_s12 = sshll.u32 %s258_s11, 4  ;;  %s75_s12 = int_to_ptr.vmem [resolvable:$true] %s74_s12 }
   0x7   : > { %p166_p4 = pneg %p61_p2  ;;  %87 = sbr.rel (%p61_p2) target bundleno = 20 (0x14), region = 24 }
   0x9   : > { %p167_p5 = pnand %p170_p3, %p166_p4 }
   0xb   : > { %169 = dma.hbm_to_vmem [thread:$0]  (!%p167_p5), %s73_s10, 128, %s75_s12, [#allocation3]  }
   0xc   : > { %247 = dma.done.wait (%p170_p3), [#allocation3], 128  }
   0xd   : > { %249 = vsyncadd (%p170_p3), [#allocation3], 4294967168  ;;  %s259_s13 = smov [#allocation5]   ;;  %s109_s17 = sshll.u32 %s288_s1, 4  ;;  %v98_v0 = vld [vmem:[#allocation2] sm:$0xff]  ;;  %s110_s17 = int_to_ptr.hbm [resolvable:$true] %s109_s17 }
   0xe   : > { %s107_s14 = sshll.u32 %s259_s13, 4  ;;  %p172_p6 = scmp.eq.s32.totalorder %s149_s7, 1  ;;  %v99_v1 = vadd.f32 1.0, %v98_v0  ;;  %s108_s14 = int_to_ptr.vmem [resolvable:$true] %s107_s14 }
  0x10   : > { %100 = vst [vmem:[#allocation5] sm:$0xff] %v99_v1 }
  0x11   : > { %163 = dma.vmem_to_hbm [thread:$0]  (%p172_p6), %s108_s14, 128, %s110_s17, [#allocation4]  }
  0x12   : > { %251 = dma.done.wait (%p172_p6), [#allocation4], 128  }
  0x13   : > { %253 = vsyncadd (%p172_p6), [#allocation4], 4294967168 }
  0x14 PF: > { %s13_s6 = sadd.s32 1, %s256_s6  }
  0x15   : > { %p10_p7 = scmp.ge.s32.totalorder %s13_s6, 4  }
  0x17   :  { %12 = sbr.rel (!%p10_p7) target bundleno = 2 (0x2), region = 53 }
  0x1c   :  { %123 = vsyncpa [#allocation3], 1 }
  0x1d   :  { %125 = vsyncpa [#allocation3 + $0x1], 1 }
  0x1e   :  { %126 = vsyncpa [#allocation4], 1 }
  0x1f   :  { %128 = vsyncpa [#allocation4 + $0x1], 1 }

// kernel: _cost_matrix_impl.1
= control target key start
LH: loop header
LB: loop body
LE: loop exit
PB: predicated region body
PF: predicated region fallthrough
CT: control target
= control target key end

     0   :  { %v407_v1 = vmov 0   ;;  %v408_v2 = vmov 1   ;;  %s409_s23 = smov 127   ;;  %s410_s26 = smov 126   ;;  %v411_v16 = vmov 2   ;;  %v412_v36 = vmov 3   ;;  %s685_s1 = inlined_call_operand.vmem [shape: f32[16,4], index: 1, kind: input, shape index: {}]   ;;  %s686_s2 = inlined_call_operand.vmem [shape: f32[128,128], index: 2, kind: input, shape index: {}]   ;;  %s687_s3 = inlined_call_operand.vmem [shape: f32[9,128], index: 3, kind: input, shape index: {}]   ;;  %s688_s0 = inlined_call_operand.vmem [shape: f32[16,128], index: 0, kind: input, shape index: {}]   ;;  %s689_s4 = inlined_call_operand.vmem [shape: f32[16,128], index: 4, kind: output, shape index: {}]  }
   0x1   :  { %v441_v0 = vld [vmem:[%s685_s1] sm:$0xff]  ;;  %373 = vset.pattern.permute.xlu1 %v407_v1  ;;  %375 = vset.pattern.permute.xlu0 %v408_v2  ;;  %v34_v3 = vld [vmem:[%s686_s2 + $0x78] sm:$0xff]  ;;  %v451_v4 = vld [vmem:[%s685_s1 + $0x8] sm:$0xff] }
   0x2   :  { %v184_v5 = vmul.f32 0.5, %v441_v0  ;;  %126 = vperm.xlu1 %373, %v441_v0   ;;  %35 = vmatpush.msra.mxu0 %v34_v3  ;;  %v33_v6 = vld [vmem:[%s686_s2 + $0x70] sm:$0xff]  ;;  %v32_v7 = vld [vmem:[%s686_s2 + $0x68] sm:$0xff]  ;;  %v31_v8 = vld [vmem:[%s686_s2 + $0x60] sm:$0xff]  ;;  %v185_v10 = vmul.f32 0.5, %v451_v4 }
   0x3   :  { %351 = vmatpush.msra.mxu1 %v34_v3  ;;  %200 = vrot.lane.b32.xlu2 %v451_v4, %s409_s23  ;;  %v30_v9 = vld [vmem:[%s686_s2 + $0x58] sm:$0xff]  ;;  %v29_v11 = vld [vmem:[%s686_s2 + $0x50] sm:$0xff]  ;;  %v28_v12 = vld [vmem:[%s686_s2 + $0x48] sm:$0xff] }
   0x4   :  { %188 = vrot.lane.b32.xlu0 %v184_v5, %s410_s26  ;;  %36 = vmatpush.msra.mxu0 %v33_v6  ;;  %v27_v13 = vld [vmem:[%s686_s2 + $0x40] sm:$0xff]  ;;  %v26_v14 = vld [vmem:[%s686_s2 + $0x38] sm:$0xff]  ;;  %v25_v15 = vld [vmem:[%s686_s2 + $0x30] sm:$0xff] }
   0x5   :  { %352 = vmatpush.msra.mxu1 %v33_v6  ;;  %374 = vset.pattern.permute.xlu2 %v407_v1  ;;  %v24_v17 = vld [vmem:[%s686_s2 + $0x28] sm:$0xff]  ;;  %v23_v18 = vld [vmem:[%s686_s2 + $0x20] sm:$0xff]  ;;  %v22_v19 = vld [vmem:[%s686_s2 + $0x18] sm:$0xff] }
   0x6   :  { %37 = vmatpush.msra.mxu0 %v32_v7  ;;  %v21_v20 = vld [vmem:[%s686_s2 + $0x10] sm:$0xff]  ;;  %v20_v21 = vld [vmem:[%s686_s2 + $0x8] sm:$0xff]  ;;  %v19_v22 = vld [vmem:[%s686_s2] sm:$0xff] }
   0x7   :  { %353 = vmatpush.msra.mxu1 %v32_v7  ;;  %v17_v23 = vld [vmem:[%s688_s0] sm:$0xff]  ;;  %v18_v24 = vld [vmem:[%s688_s0 + $0x8] sm:$0xff] }
   0x8   :  { %38 = vmatpush.msra.mxu0 %v31_v8 }
   0x9   :  { %354 = vmatpush.msra.mxu1 %v31_v8 }
   0xa   :  { %198 = vrot.lane.b32.xlu1 %v441_v0, %s409_s23  ;;  %39 = vmatpush.msra.mxu0 %v30_v9 }
   0xb   :  { %355 = vmatpush.msra.mxu1 %v30_v9  ;;  %131 = vperm.xlu2 %374, %v451_v4  }
   0xc   :  { %190 = vrot.lane.b32.xlu0 %v185_v10, %s410_s26  ;;  %40 = vmatpush.msra.mxu0 %v29_v11 }
   0xd   :  { %356 = vmatpush.msra.mxu1 %v29_v11  ;;  %376 = vset.pattern.permute.xlu1 %v408_v2 }
   0xe   :  { %41 = vmatpush.msra.mxu0 %v28_v12 }
   0xf   :  { %357 = vmatpush.msra.mxu1 %v28_v12 }
  0x10   :  { %42 = vmatpush.msra.mxu0 %v27_v13 }
  0x11   :  { %358 = vmatpush.msra.mxu1 %v27_v13 }
  0x12   :  { %43 = vmatpush.msra.mxu0 %v26_v14  ;;  %144 = vperm.xlu1 %376, %v451_v4  }
  0x13   :  { %359 = vmatpush.msra.mxu1 %v26_v14  ;;  %377 = vset.pattern.permute.xlu2 %v411_v16 }
  0x14   :  { %140 = vperm.xlu0 %375, %v441_v0   ;;  %44 = vmatpush.msra.mxu0 %v25_v15 }
  0x15   :  { %360 = vmatpush.msra.mxu1 %v25_v15  ;;  %155 = vperm.xlu2 %377, %v441_v0  }
  0x16   :  { %45 = vmatpush.msra.mxu0 %v24_v17 }
  0x17   :  { %361 = vmatpush.msra.mxu1 %v24_v17 }
  0x18   :  { %46 = vmatpush.msra.mxu0 %v23_v18 }
  0x19   :  { %362 = vmatpush.msra.mxu1 %v23_v18 }
  0x1a   :  { %47 = vmatpush.msra.mxu0 %v22_v19  ;;  %378 = vset.pattern.permute.xlu1 %v411_v16 }
  0x1b   :  { %363 = vmatpush.msra.mxu1 %v22_v19  ;;  %159 = vperm.xlu1 %378, %v451_v4  }
  0x1c   :  { %48 = vmatpush.msra.mxu0 %v21_v20  ;;  %380 = vset.pattern.permute.xlu0 %v407_v1 }
  0x1d   :  { %364 = vmatpush.msra.mxu1 %v21_v20  ;;  %379 = vset.pattern.permute.xlu2 %v407_v1 }
  0x1e   :  { %49 = vmatpush.msra.mxu0 %v20_v21 }
  0x1f   :  { %365 = vmatpush.msra.mxu1 %v20_v21 }
  0x20   :  { %50 = vmatpush.msra.mxu0 %v19_v22 }
  0x21   :  { %366 = vmatpush.msra.mxu1 %v19_v22  ;;  %51 = vmatmul.f32.vlgmr.msra.gmra.mxu0 %v17_v23 }
  0x22   :  { %54 = vmatmul.f32.vlgmr.msra.gmra.mxu1 %v18_v24  ;;  %v390_v24 = vld [vmem:[%s687_s3 + $0x8] ss:$0 sm:$0xff] }
  0x23   :  { %381 = vset.pattern.permute.xlu1 %v407_v1 }
  0x5d   :  { %v201_v32 = vpop.permute.xlu2 %200 }
  0x5e   :  { %v205_v34 = vmul.f32 %v201_v32, %v451_v4 }
  0x65   :  { %v539_v42 = vpop.permute.xlu2 %131 }
  0x6f   :  { %v548_v47 = vpop.permute.xlu2 %155 }
  0x74   :  { %v524_v31 = vpop.permute.xlu1 %126 }
  0x76   :  { %v189_v25 = vpop.permute.xlu0 %188 }
  0x77   :  { %v194_v26 = vsub.f32 %v441_v0, %v189_v25  ;;  %v196_v27 = vadd.f32 %v189_v25, %v441_v0 }
  0x79   :  { %208 = vperm.xlu2 %379, %v196_v27   ;;  %221 = vperm.xlu1 %381, %v194_v26  }
  0x7c   :  { %v199_v33 = vpop.permute.xlu1 %198 }
  0x7d   :  { %v204_v35 = vmul.f32 %v199_v33, %v441_v0 }
  0x7e   :  { %v191_v28 = vpop.permute.xlu0 %190 }
  0x7f   :  { %v195_v29 = vsub.f32 %v451_v4, %v191_v28  ;;  %v197_v30 = vadd.f32 %v191_v28, %v451_v4 }
  0x81   :  { %382 = vset.pattern.permute.xlu1 %v408_v2  ;;  %213 = vperm.xlu0 %380, %v197_v30  }
  0x82   :  { %226 = vperm.xlu2 %379, %v195_v29   ;;  %237 = vperm.xlu1 %382, %v196_v27  }
  0x84   :  { %v544_v45 = vpop.permute.xlu1 %144 }
  0x86   :  { %v560_v55 = vpop.permute.xlu0 %140 }
  0x89   :  { %384 = vset.pattern.permute.xlu0 %v408_v2 }
  0x8a   :  { %383 = vset.pattern.permute.xlu2 %v408_v2  ;;  %248 = vperm.xlu0 %384, %v194_v26  }
  0x8b   :  { %252 = vperm.xlu1 %382, %v195_v29   ;;  %241 = vperm.xlu2 %383, %v197_v30  }
  0x8d   :  { %v551_v50 = vpop.permute.xlu1 %159 }
  0x92   :  { %388 = vset.pattern.permute.xlu0 %v412_v36 }
  0x93   :  { %386 = vset.pattern.permute.xlu1 %v411_v16  ;;  %385 = vset.pattern.permute.xlu2 %v411_v16 }
  0x94   :  { %174 = vperm.xlu0 %388, %v451_v4   ;;  %271 = vperm.xlu1 %386, %v205_v34  }
  0x95   :  { %266 = vperm.xlu2 %385, %v204_v35  }
  0x9c   :  { %389 = vset.pattern.permute.xlu0 %v411_v16 }
  0x9d   :  { %387 = vset.pattern.permute.xlu2 %v412_v36 }
  0x9e   :  { %170 = vperm.xlu2 %387, %v441_v0   ;;  %v532_v37 = vpop.f32.mrf.mxu0  ;;  %v574_v0 = vld [vmem:[%s687_s3] sm:$0xff] }
  0x9f   :  { %v349_v38 = vclamps-f32 %v532_v37, 50.0  ;;  %v537_v41 = vpop.f32.mrf.mxu1  ;;  %v216_v4 = vperm.slane %v574_v0, 6  ;;  %v229_v5 = vperm.slane %v574_v0, 4  ;;  %v134_v10 = vperm.slane %v574_v0, 0 }
  0xa0   :  { %v350_v43 = vclamps-f32 %v537_v41, 50.0  ;;  %v255_v12 = vperm.slane %v574_v0, 5  ;;  %v244_v16 = vperm.slane %v574_v0, 7 }
  0xa1   :  { %v62_v39 = vsub.f32 0.0, %v349_v38  ;;  %v135_v7 = vsub.f32 %v524_v31, %v134_v10 }
  0xa2   :  { %v63_v44 = vsub.f32 0.0, %v350_v43 }
  0xa3   :  { %v64_v40 = vmul.f32 1.442695, %v62_v39 }
  0xa4   :  { %v66_v48 = vmul.f32 1.442695, %v63_v44 }
  0xa5   :  { %391 = vpow2.f32 %v64_v40 }
  0xa6   :  { %393 = vpow2.f32 %v66_v48 }
  0xab   :  { %v546_v46 = vpop.eup %391 }
  0xac   :  { %v68_v49 = vadd.f32 1.0, %v546_v46  ;;  %v553_v52 = vpop.eup %393 }
  0xad   :  { %v558_v54 = vadd.f32 1.0, %v553_v52 }
  0xae   :  { %395 = vrcp.f32 %v68_v49  ;;  %vm75_vm0 = vweird.f32 %v68_v49  ;;  %v79_v1 = vand.u32 2147483647, %v68_v49  ;;  %v81_v2 = vand.u32 2147483648, %v68_v49 }
  0xaf   :  { %397 = vrcp.f32 %v558_v54  ;;  %vm89_vm4 = vweird.f32 %v558_v54  ;;  %v95_v18 = vand.u32 2147483648, %v558_v54 }
  0xb0   :  { %vm587_vm3 = vcmp.eq.f32.partialorder %v79_v1, 8.507059e+37  ;;  %399 = vlog2.f32 %v68_v49  ;;  %v82_v13 = vor.u32 1.1754944e-38, %v81_v2  ;;  %v93_v2 = vand.u32 2147483647, %v558_v54 }
  0xb1   :  { %401 = vlog2.f32 %v558_v54 }
  0xb2   :  { %vm94_vm7 = vcmp.eq.f32.partialorder %v93_v2, 8.507059e+37 }
  0xb4   :  { %v555_v53 = vpop.eup %395 }
  0xb5   :  { %v71_v56 = vmul.f32 %v555_v53, %v68_v49  ;;  %v566_v60 = vpop.eup %397  ;;  %vm76_vm1 = vweird.f32 %v555_v53 }
  0xb6   :  { %v85_v3 = vmul.f32 %v566_v60, %v558_v54  ;;  %vm582_vm2 = vmor %vm75_vm0, %vm76_vm1  ;;  %vm90_vm5 = vweird.f32 %v566_v60  ;;  %v400_v35 = vpop.eup %399 }
  0xb7   :  { %v72_v59 = vsub.f32 1.0, %v71_v56  ;;  %vm616_vm6 = vmor %vm89_vm4, %vm90_vm5 }
  0xb8   :  { %v86_v14 = vsub.f32 1.0, %v85_v3 }
  0xb9   :  { %v73_v61 = vmul.f32 %v555_v53, %v72_v59 }
  0xba   :  { %v87_v30 = vmul.f32 %v566_v60, %v86_v14  ;;  %v96_v14 = vor.u32 1.1754944e-38, %v95_v18  ;;  %v136_v18 = vsub.f32 %v539_v42, %v134_v10  ;;  %v402_v42 = vpop.eup %401 }
  0xbb   :  { %v74_v6 = vadd.f32 %v555_v53, %v73_v61 }
  0xbc   :  { %v88_v1 = vadd.f32 %v566_v60, %v87_v30 }
  0xbd   :  { %v78_v17 = vsel %vm582_vm2, %v555_v53, %v74_v6 }
  0xd3   :  { %v209_v51 = vpop.permute.xlu2 %208 }
  0xd4   :  { %v217_v15 = vmin.f32 %v209_v51, %v216_v4  ;;  %v279_v20 = vmax.f32 %v209_v51, %v216_v4 }
  0xdc   :  { %v564_v58 = vpop.permute.xlu2 %226 }
  0xdd   :  { %v231_v36 = vmax.f32 %v564_v58, %v229_v5  ;;  %v282_v3 = vmin.f32 %v564_v58, %v229_v5  ;;  %v162_v58 = vperm.slane %v574_v0, 2 }
  0xe5   :  { %v242_v8 = vpop.permute.xlu2 %241 }
  0xe6   :  { %v246_v32 = vmin.f32 %v242_v8, %v244_v16  ;;  %v288_v48 = vmax.f32 %v242_v8, %v244_v16 }
  0xeb   :  { %v222_v57 = vpop.permute.xlu1 %221 }
  0xec   :  { %v230_v9 = vmax.f32 %v222_v57, %v229_v5  ;;  %v281_v19 = vmin.f32 %v222_v57, %v229_v5  ;;  %v83_v5 = vsel %vm587_vm3, %v82_v13, %v78_v17 }
  0xee   :  { %v232_v21 = vsub.f32 %v217_v15, %v230_v9  ;;  %v283_v39 = vsub.f32 %v279_v20, %v281_v19  ;;  %v92_v20 = vsel %vm616_vm6, %v566_v60, %v88_v1 }
  0xef   :  { %v267_v51 = vpop.permute.xlu2 %266  ;;  %v97_v60 = vsel %vm94_vm7, %v96_v14, %v92_v20 }
  0xf0   :  { %v234_v49 = vmax.f32 %v232_v21, 0.0  ;;  %v275_v57 = vadd.f32 %v390_v24, %v267_v51  ;;  %v103_v10 = vmul.f32 %v553_v52, %v97_v60  ;;  %v105_v52 = vmul.f32 %v97_v60, %v97_v60 }
  0xf3   :  { %v569_v62 = vpop.permute.xlu0 %213 }
  0xf4   :  { %v238_v63 = vpop.permute.xlu1 %237  ;;  %v218_v22 = vmin.f32 %v569_v62, %v216_v4  ;;  %v280_v53 = vmax.f32 %v569_v62, %v216_v4  ;;  %v285_v4 = vmax.f32 %v283_v39, 0.0 }
  0xf5   :  { %v245_v25 = vmin.f32 %v238_v63, %v244_v16  ;;  %v287_v26 = vmax.f32 %v238_v63, %v244_v16 }
  0xf6   :  { %v233_v59 = vsub.f32 %v218_v22, %v231_v36  ;;  %v284_v31 = vsub.f32 %v280_v53, %v282_v3  ;;  %v138_v36 = vand.u32 2147483647, %v136_v18  ;;  %v101_v53 = vmul.f32 0.6931472, %v402_v42 }
  0xf7   :  { %v107_v3 = vmul.f32 0.75, %v105_v52 }
  0xf8   :  { %v235_v15 = vmax.f32 %v233_v59, 0.0 }
  0xfc   :  { %v249_v23 = vpop.permute.xlu0 %248 }
  0xfd   :  { %v253_v27 = vpop.permute.xlu1 %252  ;;  %v256_v28 = vmax.f32 %v249_v23, %v255_v12  ;;  %v289_v29 = vmin.f32 %v249_v23, %v255_v12  ;;  %v102_v23 = vmul.f32 %v546_v46, %v83_v5  ;;  %v163_v46 = vsub.f32 %v548_v47, %v162_v58 }
  0xfe   :  { %v257_v33 = vmax.f32 %v253_v27, %v255_v12  ;;  %v290_v34 = vmin.f32 %v253_v27, %v255_v12  ;;  %v147_v12 = vperm.slane %v574_v0, 1  ;;  %v164_v47 = vsub.f32 %v551_v50, %v162_v58 }
  0xff   :  { %v258_v40 = vsub.f32 %v245_v25, %v256_v28  ;;  %v291_v44 = vsub.f32 %v287_v26, %v289_v29  ;;  %v286_v26 = vmax.f32 %v284_v31, 0.0  ;;  %v99_v29 = vmul.f32 0.6931472, %v400_v35  ;;  %v171_v35 = vpop.permute.xlu2 %170 }
 0x100   :  { %v259_v56 = vsub.f32 %v246_v32, %v257_v33  ;;  %v292_v6 = vsub.f32 %v288_v48, %v290_v34  ;;  %v148_v25 = vsub.f32 %v560_v55, %v147_v12  ;;  %v149_v27 = vsub.f32 %v544_v45, %v147_v12 }
 0x101   :  { %v260_v61 = vmax.f32 %v258_v40, 0.0  ;;  %v293_v63 = vmax.f32 %v291_v44, 0.0  ;;  %v104_v32 = vmul.f32 %v83_v5, %v83_v5  ;;  %v112_v33 = vmul.f32 %v102_v23, %v102_v23 }
 0x102   :  { %v261_v8 = vmax.f32 %v259_v56, 0.0  ;;  %v294_v21 = vmax.f32 %v292_v6, 0.0  ;;  %v150_v55 = vand.u32 2147483647, %v148_v25  ;;  %v177_v45 = vperm.slane %v574_v0, 3 }
 0x103   :  { %v620_v9 = vmul.f32 %v260_v61, %v234_v49  ;;  %v627_v19 = vmul.f32 %v293_v63, %v285_v4  ;;  %v151_v39 = vand.u32 2147483647, %v149_v27  ;;  %v165_v40 = vand.u32 2147483647, %v163_v46 }
 0x104   :  { %v635_v13 = vmul.f32 %v261_v8, %v235_v15  ;;  %v648_v30 = vmul.f32 %v294_v21, %v286_v26  ;;  %v108_v44 = vadd.f32 %v349_v38, %v99_v29  ;;  %v106_v49 = vmul.f32 0.75, %v104_v32 }
 0x105   :  { %v277_v16 = vsub.f32 %v275_v57, %v620_v9  ;;  %v114_v51 = vmul.f32 0.25, %v112_v33  ;;  %v113_v0 = vmul.f32 %v103_v10, %v103_v10  ;;  %v178_v57 = vsub.f32 %v171_v35, %v177_v45 }
 0x106   :  { %v272_v22 = vpop.permute.xlu1 %271  ;;  %v153_v61 = vadd.f32 %v151_v39, %v138_v36  ;;  %v166_v63 = vand.u32 2147483647, %v164_v47  ;;  %v175_v37 = vpop.permute.xlu0 %174  ;;  %v110_v38 = vmul.f32 %v108_v44, %v106_v49  ;;  %v109_v6 = vadd.f32 %v350_v43, %v101_v53 }
 0x107   :  { %v297_v11 = vmul.f32 %v627_v19, %v277_v16  ;;  %v276_v17 = vadd.f32 %v390_v24, %v272_v22  ;;  %v137_v24 = vand.u32 2147483647, %v135_v7  ;;  %v331_v50 = vsub.f32 %v627_v19, %v277_v16 }
 0x108   :  { %v116_v2 = vmul.f32 %v114_v51, %v99_v29  ;;  %v115_v62 = vmul.f32 0.25, %v113_v0  ;;  %v180_v4 = vand.u32 2147483647, %v178_v57  ;;  %v168_v12 = vadd.f32 %v166_v63, %v153_v61 }
 0x109   :  { %v642_v54 = vmax.f32 %v297_v11, 1e-12  ;;  %v645_v28 = vsub.f32 %v276_v17, %v635_v13  ;;  %v152_v56 = vadd.f32 %v150_v55, %v137_v24  ;;  %v333_v5 = vmul.f32 %v331_v50, %v277_v16 }
 0x10a   :  { %v179_v31 = vsub.f32 %v175_v37, %v177_v45  ;;  %v118_v22 = vsub.f32 %v116_v2, %v110_v38  ;;  %v111_v41 = vmul.f32 %v109_v6, %v107_v3  ;;  %v329_v43 = vmul.f32 %v627_v19, %v620_v9 }
 0x10b   :  { %403 = vrcp.f32 %v642_v54  ;;  %v298_v34 = vmul.f32 %v648_v30, %v645_v28  ;;  %v167_v7 = vadd.f32 %v165_v40, %v152_v56  ;;  %v312_v58 = vand.u32 2147483648, %v642_v54 }
 0x10c   :  { %v310_v20 = vand.u32 2147483647, %v642_v54  ;;  %v332_v21 = vsub.f32 %v648_v30, %v645_v28  ;;  %v117_v11 = vmul.f32 %v115_v62, %v101_v53  ;;  %vm306_vm9 = vweird.f32 %v642_v54 }
 0x10d   :  { %v658_v48 = vmax.f32 %v298_v34, 1e-12  ;;  %v182_v17 = vadd.f32 %v180_v4, %v167_v7  ;;  %v313_v16 = vor.u32 1.1754944e-38, %v312_v58  ;;  %v335_v25 = vsub.f32 %v329_v43, %v333_v5 }
 0x10e   :  { %v181_v60 = vand.u32 2147483647, %v179_v31  ;;  %vm311_vm11 = vcmp.eq.f32.partialorder %v310_v20, 8.507059e+37  ;;  %v334_v46 = vmul.f32 %v332_v21, %v645_v28  ;;  %v119_v28 = vsub.f32 %v117_v11, %v111_v41 }
 0x10f   :  { %405 = vrcp.f32 %v658_v48  ;;  %v326_v29 = vand.u32 2147483648, %v658_v48  ;;  %v324_v19 = vand.u32 2147483647, %v658_v48  ;;  %v339_v32 = vadd.f32 %v182_v17, %v118_v22 }
 0x110   :  { %vm320_vm13 = vweird.f32 %v658_v48  ;;  %v183_v55 = vadd.f32 %v181_v60, %v168_v12 }
 0x111   :  { %v404_v59 = vpop.eup %403  ;;  %v327_v10 = vor.u32 1.1754944e-38, %v326_v29  ;;  %vm325_vm15 = vcmp.eq.f32.partialorder %v324_v19, 8.507059e+37 }
 0x112   :  { %v302_v1 = vmul.f32 %v404_v59, %v642_v54  ;;  %vm307_vm8 = vweird.f32 %v404_v59  ;;  %v330_v54 = vmul.f32 %v648_v30, %v635_v13  ;;  %v340_v35 = vadd.f32 %v183_v55, %v119_v28 }
 0x113   :  { %vm308_vm10 = vmor %vm306_vm9, %vm307_vm8 }
 0x114   :  { %v303_v8 = vsub.f32 1.0, %v302_v1  ;;  %v336_v34 = vsub.f32 %v330_v54, %v334_v46 }
 0x115   :  { %v406_v14 = vpop.eup %405 }
 0x116   :  { %v304_v15 = vmul.f32 %v404_v59, %v303_v8  ;;  %v316_v23 = vmul.f32 %v406_v14, %v658_v48  ;;  %vm321_vm12 = vweird.f32 %v406_v14 }
 0x117   :  { %vm322_vm14 = vmor %vm320_vm13, %vm321_vm12 }
 0x118   :  { %v305_v18 = vadd.f32 %v404_v59, %v304_v15  ;;  %v317_v26 = vsub.f32 1.0, %v316_v23 }
 0x11a   :  { %v309_v27 = vsel %vm308_vm10, %v404_v59, %v305_v18  ;;  %v318_v9 = vmul.f32 %v406_v14, %v317_v26 }
 0x11b   :  { %v314_v24 = vsel %vm311_vm11, %v313_v16, %v309_v27 }
 0x11c   :  { %v337_v33 = vmul.f32 %v335_v25, %v314_v24  ;;  %v319_v42 = vadd.f32 %v406_v14, %v318_v9 }
 0x11e   :  { %v341_v45 = vsub.f32 %v339_v32, %v337_v33  ;;  %v323_v36 = vsel %vm322_vm14, %v406_v14, %v319_v42 }
 0x11f   :  { %v328_v39 = vsel %vm325_vm15, %v327_v10, %v323_v36 }
 0x120   :  { %343 = vst [vmem:[%s689_s4] sm:$0xff] %v341_v45  ;;  %v338_v47 = vmul.f32 %v336_v34, %v328_v39 }
 0x122   :  { %v342_v40 = vsub.f32 %v340_v35, %v338_v47 }
 0x124   :  { %344 = vst [vmem:[%s689_s4 + $0x8] sm:$0xff] %v342_v40 }

</bundles_post_ra>
